<compile_context>
chip_gen: v7x
topology: tpu7x:2x2x1
jax: 0.10.0
libtpu: 0.0.40
codegen_flags: <defaults>
</compile_context>

<pallas_src>
import functools
import math

import jax
import jax.numpy as jnp
from jax.experimental import pallas as pl
from jax.experimental.pallas import tpu as pltpu

NEGINF = -100.0          # module's arc-mask constant (matches PyTorch default)
PAD_NEG = -1.0e30        # key-padding additive mask: exp underflows to exactly 0,
                         # but stays finite if an entire row is padded (no NaN).


def _graph_attn_kernel(q_ref, x_ref, arcs_ref, kpm_ref, gate_ref,
                       w_in_ref, b_in_ref, w_o_ref, b_o_ref,
                       out_ref, *, approx_reciprocal):
    TB, L, E = x_ref.shape
    R = TB * L
    scale = 1.0 / math.sqrt(E)            # nhead == 1 -> head_dim == embd_dim
    cdt = w_in_ref.dtype                  # MXU compute dtype (bf16 or f32)

    x_f32 = x_ref[...]                                    # (TB, L, E) f32
    q_in = q_ref[...].reshape(R, E)                       # (R, E) compute dtype
    x_in = x_f32.reshape(R, E).astype(cdt)                # (R, E) compute dtype

    # --- fused in-projection: cols [0,E) = Wq^T, cols [E,3E) = Wk^T|Wv^T ---
    w_in = w_in_ref[...]                                  # (E, 3E) cdt
    b_in = b_in_ref[...]                                  # (1, 3E) f32
    q = (jnp.dot(q_in, w_in[:, :E], preferred_element_type=jnp.float32)
         + b_in[:, :E]) * scale                           # (R, E) f32
    kv = (jnp.dot(x_in, w_in[:, E:], preferred_element_type=jnp.float32)
          + b_in[:, E:])                                  # (R, 2E) f32

    q3 = q.reshape(TB, L, E).astype(cdt)
    k3 = kv[:, :E].reshape(TB, L, E).astype(cdt)
    v3 = kv[:, E:].reshape(TB, L, E).astype(cdt)

    # --- attention scores + additive arc mask + key-padding mask ---
    scores = jnp.einsum("bqe,bke->bqk", q3, k3,
                        preferred_element_type=jnp.float32)   # (TB, L, L) f32
    arc = arcs_ref[...].astype(jnp.float32)                   # int8 -> f32 in-kernel
    scores = scores + NEGINF * (1.0 - arc) + kpm_ref[...]     # (TB,1,L) broadcast

    # --- softmax over keys (reciprocal on the EUP) ---
    m = jnp.max(scores, axis=-1, keepdims=True)
    p = jnp.exp(scores - m)
    denom = jnp.sum(p, axis=-1, keepdims=True)
    attn = p * pl.reciprocal(denom, approx=approx_reciprocal)

    # --- attention output + out-projection ---
    ao = jnp.einsum("bqk,bke->bqe", attn.astype(cdt), v3,
                    preferred_element_type=jnp.float32)       # (TB, L, E) f32
    ao = (jnp.dot(ao.reshape(R, E).astype(cdt), w_o_ref[...],
                  preferred_element_type=jnp.float32)
          + b_o_ref[...]).reshape(TB, L, E)

    # --- gated residual epilogue (f32 VPU; safe on v5e which has no bf16 VALU) ---
    g = jax.nn.sigmoid(gate_ref[...])                         # (TB, L, 1)
    out_ref[...] = (x_f32 * g + ao + (1.0 - g)).astype(out_ref.dtype)


def _pick_batch_tile(bsz, maxlen):
    # Target ~512 attention rows per grid step (amortize ~0.35us/step overhead),
    # but keep >= 2 grid steps when possible so v7x's two TensorCores are used.
    tb = max(1, 512 // max(maxlen, 1))
    if bsz >= 2:
        tb = min(tb, (bsz + 1) // 2)
    return max(1, min(tb, bsz))


def simple_graph_attention_layer(x, node_embd, arcs, lengths, params,
                                 *, compute_dtype=jnp.bfloat16, batch_tile=None):
    bsz, maxlen = x.shape
    E = node_embd.shape[-1]

    # ---- glue in plain JAX: embedding gathers, weight fusion, mask prep ----
    # TODO(synk): for very large B*L, move these gathers in-kernel (scalar-prefetch
    # token ids, keep the small embedding tables resident in VMEM).
    q_embd = params["query_embd"][x].astype(compute_dtype)        # (B, L, E)
    gate = params["gate_embd"][x].astype(jnp.float32)             # (B, L, 1)

    wq, wk, wv = jnp.split(params["in_proj_weight"], 3, axis=0)   # each (E, E)
    bq, bk, bv = jnp.split(params["in_proj_bias"], 3, axis=0)     # each (E,)
    w_in = jnp.concatenate([wq.T, wk.T, wv.T], axis=1).astype(compute_dtype)  # (E, 3E)
    b_in = jnp.concatenate([bq, bk, bv]).reshape(1, 3 * E).astype(jnp.float32)
    w_o = params["out_proj_weight"].T.astype(compute_dtype)       # (E, E)
    b_o = params["out_proj_bias"].reshape(1, E).astype(jnp.float32)

    node_f = node_embd.astype(jnp.float32)
    arcs_i8 = arcs.astype(jnp.int8)                 # binary arcs -> 4x less HBM traffic
    kpm_add = jnp.where(
        jnp.arange(maxlen, dtype=jnp.int32)[None, :] >= lengths.astype(jnp.int32)[:, None],
        PAD_NEG, 0.0).astype(jnp.float32).reshape(bsz, 1, maxlen)   # (B, 1, L)

    if batch_tile is None:
        batch_tile = _pick_batch_tile(bsz, maxlen)
    tb = max(1, min(batch_tile, bsz))
    nb = pl.cdiv(bsz, tb)
    bpad = nb * tb
    if bpad != bsz:                                 # pad batch to a multiple of tb
        pad3 = ((0, bpad - bsz), (0, 0), (0, 0))
        q_embd = jnp.pad(q_embd, pad3)
        node_f = jnp.pad(node_f, pad3)
        arcs_i8 = jnp.pad(arcs_i8, pad3)
        gate = jnp.pad(gate, pad3)
        kpm_add = jnp.pad(kpm_add, pad3)

    data_map = lambda i: (i, 0, 0)
    w_map = lambda i: (0, 0)

    kernel = functools.partial(
        _graph_attn_kernel,
        approx_reciprocal=(compute_dtype != jnp.float32))

    # TODO(synk): for maxlen >~ 1K, add a key-dimension grid axis with online
    # softmax (flash-style) so the dense (L, L) scores never live whole in VMEM.
    out = pl.pallas_call(
        kernel,
        out_shape=jax.ShapeDtypeStruct((bpad, maxlen, E), jnp.float32),
        grid_spec=pltpu.PrefetchScalarGridSpec(
            num_scalar_prefetch=0,
            grid=(nb,),
            in_specs=[
                pl.BlockSpec((tb, maxlen, E), data_map),        # query embeddings
                pl.BlockSpec((tb, maxlen, E), data_map),        # node embeddings
                pl.BlockSpec((tb, maxlen, maxlen), data_map),   # arcs (int8)
                pl.BlockSpec((tb, 1, maxlen), data_map),        # key-padding additive mask
                pl.BlockSpec((tb, maxlen, 1), data_map),        # gate logits
                pl.BlockSpec((E, 3 * E), w_map),                # fused Wq^T|Wk^T|Wv^T
                pl.BlockSpec((1, 3 * E), w_map),                # fused in-proj bias
                pl.BlockSpec((E, E), w_map),                    # Wo^T
                pl.BlockSpec((1, E), w_map),                    # bo
            ],
            out_specs=pl.BlockSpec((tb, maxlen, E), data_map),
        ),
        compiler_params=pltpu.CompilerParams(
            dimension_semantics=("parallel",)),
    )(q_embd, node_f, arcs_i8, kpm_add, gate, w_in, b_in, w_o, b_o)

    return out[:bsz]


def _reference(x, node_embd, arcs, lengths, params):
    """Pure-JAX f32 reference reproducing the PyTorch forward (for verification)."""
    bsz, maxlen = x.shape
    E = node_embd.shape[-1]
    q_embd = params["query_embd"][x]
    gate = jax.nn.sigmoid(params["gate_embd"][x])
    wq, wk, wv = jnp.split(params["in_proj_weight"], 3, axis=0)
    bq, bk, bv = jnp.split(params["in_proj_bias"], 3, axis=0)
    wo, bo = params["out_proj_weight"], params["out_proj_bias"]
    q = (q_embd @ wq.T + bq) / math.sqrt(E)
    k = node_embd @ wk.T + bk
    v = node_embd @ wv.T + bv
    scores = jnp.einsum("bqe,bke->bqk", q, k) + (NEGINF + arcs * (-NEGINF))
    kpm = jnp.arange(maxlen)[None, :] >= lengths[:, None]
    scores = jnp.where(kpm[:, None, :], -jnp.inf, scores)
    attn = jax.nn.softmax(scores, axis=-1)
    ao = jnp.einsum("bqk,bke->bqe", attn, v) @ wo.T + bo
    return node_embd * gate + ao + (1.0 - gate)


if __name__ == "__main__":
    vocab_size, embd_dim = 16, 32
    bsz, maxlen = 3, 8          # odd batch also exercises the batch-tile padding path

    key = jax.random.PRNGKey(0)
    kq, kg, kin, kib, kow, kob, kx, kn, ka = jax.random.split(key, 9)

    params = {
        "query_embd": jax.random.normal(kq, (vocab_size, embd_dim), jnp.float32),
        "gate_embd": jax.random.normal(kg, (vocab_size, 1), jnp.float32),
        "in_proj_weight": 0.1 * jax.random.normal(kin, (3 * embd_dim, embd_dim), jnp.float32),
        "in_proj_bias": 0.05 * jax.random.normal(kib, (3 * embd_dim,), jnp.float32),
        "out_proj_weight": 0.1 * jax.random.normal(kow, (embd_dim, embd_dim), jnp.float32),
        "out_proj_bias": 0.05 * jax.random.normal(kob, (embd_dim,), jnp.float32),
    }

    x = jax.random.randint(kx, (bsz, maxlen), 0, vocab_size)
    node_embd = jax.random.normal(kn, (bsz, maxlen, embd_dim), jnp.float32)
    arcs = (jax.random.uniform(ka, (bsz, maxlen, maxlen)) > 0.5).astype(jnp.float32)
    lengths = jnp.array([maxlen, 5, 6], dtype=jnp.int32)

    ref = _reference(x, node_embd, arcs, lengths, params)

    # Performance default: bf16 MXU operands (sanity check vs f32 reference).
    out_bf16 = simple_graph_attention_layer(x, node_embd, arcs, lengths, params)
    out_bf16 = jax.block_until_ready(out_bf16)
    assert out_bf16.shape == (bsz, maxlen, embd_dim)
    assert jnp.max(jnp.abs(out_bf16 - ref)) < 1e-1, "bf16 kernel mismatch vs reference"

    # f32 compute path: tight semantic check against the pure-JAX reference.
    out_f32 = simple_graph_attention_layer(x, node_embd, arcs, lengths, params,
                                           compute_dtype=jnp.float32)
    out_f32 = jax.block_until_ready(out_f32)
    assert jnp.max(jnp.abs(out_f32 - ref)) < 2e-4, "f32 kernel mismatch vs reference"

    print("KERNEL_OK")
</pallas_src>

<mosaic_0001>
module attributes {stable_mosaic.version = 11 : i64} {
  func.func @_graph_attn_kernel(%arg0: i32, %arg1: memref<2x8x32xbf16, #tpu.memory_space<vmem>>, %arg2: memref<2x8x32xf32, #tpu.memory_space<vmem>>, %arg3: memref<2x8x8xi8, #tpu.memory_space<vmem>>, %arg4: memref<2x1x8xf32, #tpu.memory_space<vmem>>, %arg5: memref<2x8x1xf32, #tpu.memory_space<vmem>>, %arg6: memref<32x96xbf16, #tpu.memory_space<vmem>>, %arg7: memref<1x96xf32, #tpu.memory_space<vmem>>, %arg8: memref<32x32xbf16, #tpu.memory_space<vmem>>, %arg9: memref<1x32xf32, #tpu.memory_space<vmem>>, %arg10: memref<2x8x32xf32, #tpu.memory_space<vmem>>) attributes {dimension_semantics = [#tpu.dimension_semantics<parallel>], iteration_bounds = array<i64: 2>, scalar_prefetch = 0 : i64, scratch_operands = 0 : i64, tpu.core_type = #tpu.core_type<tc>, window_params = [{transform_indices = @transform_0, window_bounds = array<i64: 2, 8, 32>}, {transform_indices = @transform_1, window_bounds = array<i64: 2, 8, 32>}, {transform_indices = @transform_2, window_bounds = array<i64: 2, 8, 8>}, {transform_indices = @transform_3, window_bounds = array<i64: 2, 1, 8>}, {transform_indices = @transform_4, window_bounds = array<i64: 2, 8, 1>}, {pipeline_mode = #tpu.pipeline_mode<synchronous>, transform_indices = @transform_5, window_bounds = array<i64: 32, 96>}, {pipeline_mode = #tpu.pipeline_mode<synchronous>, transform_indices = @transform_6, window_bounds = array<i64: 1, 96>}, {pipeline_mode = #tpu.pipeline_mode<synchronous>, transform_indices = @transform_7, window_bounds = array<i64: 32, 32>}, {pipeline_mode = #tpu.pipeline_mode<synchronous>, transform_indices = @transform_8, window_bounds = array<i64: 1, 32>}, {transform_indices = @transform_9, window_bounds = array<i64: 2, 8, 32>}]} {
    %c0 = arith.constant 0 : index
    %c0_0 = arith.constant 0 : index
    %c0_1 = arith.constant 0 : index
    %0 = vector.load %arg2[%c0, %c0_0, %c0_1] : memref<2x8x32xf32, #tpu.memory_space<vmem>>, vector<2x8x32xf32>
    %c0_2 = arith.constant 0 : index
    %c0_3 = arith.constant 0 : index
    %c0_4 = arith.constant 0 : index
    %1 = vector.load %arg1[%c0_2, %c0_3, %c0_4] : memref<2x8x32xbf16, #tpu.memory_space<vmem>>, vector<2x8x32xbf16>
    %2 = vector.shape_cast %1 : vector<2x8x32xbf16> to vector<16x32xbf16>
    %3 = vector.shape_cast %0 : vector<2x8x32xf32> to vector<16x32xf32>
    %4 = arith.truncf %3 : vector<16x32xf32> to vector<16x32xbf16>
    %c0_5 = arith.constant 0 : index
    %c0_6 = arith.constant 0 : index
    %5 = vector.load %arg6[%c0_5, %c0_6] : memref<32x96xbf16, #tpu.memory_space<vmem>>, vector<32x96xbf16>
    %c0_7 = arith.constant 0 : index
    %c0_8 = arith.constant 0 : index
    %6 = vector.load %arg7[%c0_7, %c0_8] : memref<1x96xf32, #tpu.memory_space<vmem>>, vector<1x96xf32>
    %7 = vector.extract_strided_slice %5 {offsets = [0, 0], sizes = [32, 32], strides = [1, 1]} : vector<32x96xbf16> to vector<32x32xbf16>
    %cst = arith.constant dense<0.000000e+00> : vector<16x32xf32>
    %8 = tpu.matmul %2, %7, %cst {dimension_numbers = #tpu.dot_dimension_numbers<[1], [0], [0], [1], [0, 0, 1, 1], [], []>} : vector<16x32xbf16>, vector<32x32xbf16>, vector<16x32xf32> -> vector<16x32xf32>
    %9 = vector.extract_strided_slice %6 {offsets = [0, 0], sizes = [1, 32], strides = [1, 1]} : vector<1x96xf32> to vector<1x32xf32>
    %10 = vector.broadcast %9 : vector<1x32xf32> to vector<16x32xf32>
    %11 = arith.addf %8, %10 : vector<16x32xf32>
    %cst_9 = arith.constant 0.176776692 : f32
    %12 = vector.broadcast %cst_9 : f32 to vector<16x32xf32>
    %13 = arith.mulf %11, %12 : vector<16x32xf32>
    %14 = vector.extract_strided_slice %5 {offsets = [0, 32], sizes = [32, 64], strides = [1, 1]} : vector<32x96xbf16> to vector<32x64xbf16>
    %cst_10 = arith.constant dense<0.000000e+00> : vector<16x64xf32>
    %15 = tpu.matmul %4, %14, %cst_10 {dimension_numbers = #tpu.dot_dimension_numbers<[1], [0], [0], [1], [0, 0, 1, 1], [], []>} : vector<16x32xbf16>, vector<32x64xbf16>, vector<16x64xf32> -> vector<16x64xf32>
    %16 = vector.extract_strided_slice %6 {offsets = [0, 32], sizes = [1, 64], strides = [1, 1]} : vector<1x96xf32> to vector<1x64xf32>
    %17 = vector.broadcast %16 : vector<1x64xf32> to vector<16x64xf32>
    %18 = arith.addf %15, %17 : vector<16x64xf32>
    %19 = vector.shape_cast %13 : vector<16x32xf32> to vector<2x8x32xf32>
    %20 = arith.truncf %19 : vector<2x8x32xf32> to vector<2x8x32xbf16>
    %21 = vector.extract_strided_slice %18 {offsets = [0, 0], sizes = [16, 32], strides = [1, 1]} : vector<16x64xf32> to vector<16x32xf32>
    %22 = vector.shape_cast %21 : vector<16x32xf32> to vector<2x8x32xf32>
    %23 = arith.truncf %22 : vector<2x8x32xf32> to vector<2x8x32xbf16>
    %24 = vector.extract_strided_slice %18 {offsets = [0, 32], sizes = [16, 32], strides = [1, 1]} : vector<16x64xf32> to vector<16x32xf32>
    %25 = vector.shape_cast %24 : vector<16x32xf32> to vector<2x8x32xf32>
    %26 = arith.truncf %25 : vector<2x8x32xf32> to vector<2x8x32xbf16>
    "tpu.trace_start"() <{level = 10 : i32, message = "bqe,bke->bqk"}> : () -> ()
    %cst_11 = arith.constant dense<0.000000e+00> : vector<2x8x8xf32>
    %27 = tpu.matmul %20, %23, %cst_11 {dimension_numbers = #tpu.dot_dimension_numbers<[2], [2], [1], [1], [0, 0, 0, 1, 1, 1], [0], [0]>} : vector<2x8x32xbf16>, vector<2x8x32xbf16>, vector<2x8x8xf32> -> vector<2x8x8xf32>
    "tpu.trace_stop"() : () -> ()
    %c0_12 = arith.constant 0 : index
    %c0_13 = arith.constant 0 : index
    %c0_14 = arith.constant 0 : index
    %28 = vector.load %arg3[%c0_12, %c0_13, %c0_14] : memref<2x8x8xi8, #tpu.memory_space<vmem>>, vector<2x8x8xi8>
    %29 = arith.sitofp %28 : vector<2x8x8xi8> to vector<2x8x8xf32>
    %cst_15 = arith.constant 1.000000e+00 : f32
    %30 = vector.broadcast %cst_15 : f32 to vector<2x8x8xf32>
    %31 = arith.subf %30, %29 : vector<2x8x8xf32>
    %cst_16 = arith.constant -1.000000e+02 : f32
    %32 = vector.broadcast %cst_16 : f32 to vector<2x8x8xf32>
    %33 = arith.mulf %32, %31 : vector<2x8x8xf32>
    %34 = arith.addf %27, %33 : vector<2x8x8xf32>
    %c0_17 = arith.constant 0 : index
    %c0_18 = arith.constant 0 : index
    %c0_19 = arith.constant 0 : index
    %35 = vector.load %arg4[%c0_17, %c0_18, %c0_19] : memref<2x1x8xf32, #tpu.memory_space<vmem>>, vector<2x1x8xf32>
    %36 = vector.broadcast %35 : vector<2x1x8xf32> to vector<2x8x8xf32>
    %37 = arith.addf %34, %36 : vector<2x8x8xf32>
    %cst_20 = arith.constant dense<0xFF800000> : vector<2x8xf32>
    %38 = vector.multi_reduction <maximumf>, %37, %cst_20 [2] : vector<2x8x8xf32> to vector<2x8xf32>
    %39 = vector.shape_cast %38 : vector<2x8xf32> to vector<2x8x1xf32>
    %40 = vector.broadcast %39 : vector<2x8x1xf32> to vector<2x8x8xf32>
    %41 = arith.subf %37, %40 : vector<2x8x8xf32>
    %42 = math.exp %41 : vector<2x8x8xf32>
    %cst_21 = arith.constant dense<0.000000e+00> : vector<2x8xf32>
    %43 = vector.multi_reduction <add>, %42, %cst_21 [2] : vector<2x8x8xf32> to vector<2x8xf32>
    %44 = vector.shape_cast %43 : vector<2x8xf32> to vector<2x8x1xf32>
    %45 = tpu.reciprocal %44 {approx = true} : vector<2x8x1xf32> -> vector<2x8x1xf32>
    %46 = vector.broadcast %45 : vector<2x8x1xf32> to vector<2x8x8xf32>
    %47 = arith.mulf %42, %46 : vector<2x8x8xf32>
    %48 = arith.truncf %47 : vector<2x8x8xf32> to vector<2x8x8xbf16>
    "tpu.trace_start"() <{level = 10 : i32, message = "bqk,bke->bqe"}> : () -> ()
    %cst_22 = arith.constant dense<0.000000e+00> : vector<2x8x32xf32>
    %49 = tpu.matmul %48, %26, %cst_22 {dimension_numbers = #tpu.dot_dimension_numbers<[2], [1], [1], [2], [0, 0, 0, 1, 1, 2], [0], [0]>} : vector<2x8x8xbf16>, vector<2x8x32xbf16>, vector<2x8x32xf32> -> vector<2x8x32xf32>
    "tpu.trace_stop"() : () -> ()
    %50 = vector.shape_cast %49 : vector<2x8x32xf32> to vector<16x32xf32>
    %51 = arith.truncf %50 : vector<16x32xf32> to vector<16x32xbf16>
    %c0_23 = arith.constant 0 : index
    %c0_24 = arith.constant 0 : index
    %52 = vector.load %arg8[%c0_23, %c0_24] : memref<32x32xbf16, #tpu.memory_space<vmem>>, vector<32x32xbf16>
    %cst_25 = arith.constant dense<0.000000e+00> : vector<16x32xf32>
    %53 = tpu.matmul %51, %52, %cst_25 {dimension_numbers = #tpu.dot_dimension_numbers<[1], [0], [0], [1], [0, 0, 1, 1], [], []>} : vector<16x32xbf16>, vector<32x32xbf16>, vector<16x32xf32> -> vector<16x32xf32>
    %c0_26 = arith.constant 0 : index
    %c0_27 = arith.constant 0 : index
    %54 = vector.load %arg9[%c0_26, %c0_27] : memref<1x32xf32, #tpu.memory_space<vmem>>, vector<1x32xf32>
    %55 = vector.broadcast %54 : vector<1x32xf32> to vector<16x32xf32>
    %56 = arith.addf %53, %55 : vector<16x32xf32>
    %57 = vector.shape_cast %56 : vector<16x32xf32> to vector<2x8x32xf32>
    %c0_28 = arith.constant 0 : index
    %c0_29 = arith.constant 0 : index
    %c0_30 = arith.constant 0 : index
    %58 = vector.load %arg5[%c0_28, %c0_29, %c0_30] : memref<2x8x1xf32, #tpu.memory_space<vmem>>, vector<2x8x1xf32>
    %59 = arith.negf %58 : vector<2x8x1xf32>
    %60 = math.exp %59 : vector<2x8x1xf32>
    %cst_31 = arith.constant 1.000000e+00 : f32
    %61 = vector.broadcast %cst_31 : f32 to vector<2x8x1xf32>
    %62 = arith.addf %61, %60 : vector<2x8x1xf32>
    %63 = arith.divf %61, %62 : vector<2x8x1xf32>
    %64 = vector.broadcast %63 : vector<2x8x1xf32> to vector<2x8x32xf32>
    %65 = arith.mulf %0, %64 : vector<2x8x32xf32>
    %66 = arith.addf %65, %57 : vector<2x8x32xf32>
    %cst_32 = arith.constant 1.000000e+00 : f32
    %67 = vector.broadcast %cst_32 : f32 to vector<2x8x1xf32>
    %68 = arith.subf %67, %63 : vector<2x8x1xf32>
    %69 = vector.broadcast %68 : vector<2x8x1xf32> to vector<2x8x32xf32>
    %70 = arith.addf %66, %69 : vector<2x8x32xf32>
    %c0_33 = arith.constant 0 : index
    %c0_34 = arith.constant 0 : index
    %c0_35 = arith.constant 0 : index
    %71 = vector.load %arg10[%c0_33, %c0_34, %c0_35] : memref<2x8x32xf32, #tpu.memory_space<vmem>>, vector<2x8x32xf32>
    tpu.vector_store %arg10[%c0_33, %c0_34, %c0_35], %70 {strides = array<i32>} : memref<2x8x32xf32, #tpu.memory_space<vmem>>, vector<2x8x32xf32>,
    return
  }
  func.func @transform_0(%arg0: i32) -> (i32, i32, i32) {
    %c0_i32 = arith.constant 0 : i32
    %c0_i32_0 = arith.constant 0 : i32
    %c0_i32_1 = arith.constant 0 : i32
    return %arg0, %c0_i32, %c0_i32_0 : i32, i32, i32
  }
  func.func @transform_1(%arg0: i32) -> (i32, i32, i32) {
    %c0_i32 = arith.constant 0 : i32
    %c0_i32_0 = arith.constant 0 : i32
    %c0_i32_1 = arith.constant 0 : i32
    return %arg0, %c0_i32, %c0_i32_0 : i32, i32, i32
  }
  func.func @transform_2(%arg0: i32) -> (i32, i32, i32) {
    %c0_i32 = arith.constant 0 : i32
    %c0_i32_0 = arith.constant 0 : i32
    %c0_i32_1 = arith.constant 0 : i32
    return %arg0, %c0_i32, %c0_i32_0 : i32, i32, i32
  }
  func.func @transform_3(%arg0: i32) -> (i32, i32, i32) {
    %c0_i32 = arith.constant 0 : i32
    %c0_i32_0 = arith.constant 0 : i32
    %c0_i32_1 = arith.constant 0 : i32
    return %arg0, %c0_i32, %c0_i32_0 : i32, i32, i32
  }
  func.func @transform_4(%arg0: i32) -> (i32, i32, i32) {
    %c0_i32 = arith.constant 0 : i32
    %c0_i32_0 = arith.constant 0 : i32
    %c0_i32_1 = arith.constant 0 : i32
    return %arg0, %c0_i32, %c0_i32_0 : i32, i32, i32
  }
  func.func @transform_5(%arg0: i32) -> (i32, i32) {
    %c0_i32 = arith.constant 0 : i32
    %c0_i32_0 = arith.constant 0 : i32
    %c0_i32_1 = arith.constant 0 : i32
    return %c0_i32, %c0_i32_0 : i32, i32
  }
  func.func @transform_6(%arg0: i32) -> (i32, i32) {
    %c0_i32 = arith.constant 0 : i32
    %c0_i32_0 = arith.constant 0 : i32
    %c0_i32_1 = arith.constant 0 : i32
    return %c0_i32, %c0_i32_0 : i32, i32
  }
  func.func @transform_7(%arg0: i32) -> (i32, i32) {
    %c0_i32 = arith.constant 0 : i32
    %c0_i32_0 = arith.constant 0 : i32
    %c0_i32_1 = arith.constant 0 : i32
    return %c0_i32, %c0_i32_0 : i32, i32
  }
  func.func @transform_8(%arg0: i32) -> (i32, i32) {
    %c0_i32 = arith.constant 0 : i32
    %c0_i32_0 = arith.constant 0 : i32
    %c0_i32_1 = arith.constant 0 : i32
    return %c0_i32, %c0_i32_0 : i32, i32
  }
  func.func @transform_9(%arg0: i32) -> (i32, i32, i32) {
    %c0_i32 = arith.constant 0 : i32
    %c0_i32_0 = arith.constant 0 : i32
    %c0_i32_1 = arith.constant 0 : i32
    return %arg0, %c0_i32, %c0_i32_0 : i32, i32, i32
  }
}

</mosaic_0001>

<bundles_post_ra>
// kernel: tpu_custom_call.1
= control target key start
LH: loop header
LB: loop body
LE: loop exit
PB: predicated region body
PF: predicated region fallthrough
CT: control target
= control target key end

     0   :  { %s2003_s0 = inlined_call_operand.hbm [shape: bf16[4,8,32], index: 0, kind: input, shape index: {}]   ;;  %s2004_s1 = inlined_call_operand.vmem [shape: f32[4,8,32], index: 1, kind: input, shape index: {}]   ;;  %s2005_s2 = inlined_call_operand.hbm [shape: s8[4,8,8], index: 2, kind: input, shape index: {}]   ;;  %s2006_s3 = inlined_call_operand.hbm [shape: f32[4,1,8], index: 3, kind: input, shape index: {}]   ;;  %s2007_s4 = inlined_call_operand.vmem [shape: f32[4,8,1], index: 4, kind: input, shape index: {}]   ;;  %s2008_s5 = inlined_call_operand.vmem [shape: bf16[32,96], index: 5, kind: input, shape index: {}]   ;;  %s2009_s6 = inlined_call_operand.vmem [shape: f32[1,96], index: 6, kind: input, shape index: {}]   ;;  %s2010_s7 = inlined_call_operand.hbm [shape: bf16[32,32], index: 7, kind: input, shape index: {}]   ;;  %s2011_s8 = inlined_call_operand.vmem [shape: f32[1,32], index: 8, kind: input, shape index: {}]   ;;  %s2012_s9 = inlined_call_operand.hbm [shape: f32[4,8,32], index: 9, kind: output, shape index: {}]  }
   0x1   :  { %2030 = sst [smem:[#allocation21_spill]] %s2005_s2 }
   0x2   :  { %2031 = sst [smem:[#allocation22_spill]] %s2011_s8 }
   0x3   :  { %2032 = sst [smem:[#allocation23_spill]] %s2012_s9 }
   0x4   :  { %14 = vsyncpa [#allocation3], 0 }
   0x5   :  { %16 = vsyncpa [#allocation3 + $0x1], 0 }
   0x6   :  { %17 = vsyncpa [#allocation6], 0 }
   0x7   :  { %19 = vsyncpa [#allocation6 + $0x1], 0 }
   0x8   :  { %20 = vsyncpa [#allocation9], 0 }
   0x9   :  { %21 = vsyncpa [#allocation4], 0 }
   0xa   :  { %23 = vsyncpa [#allocation4 + $0x1], 0  ;;  %s1629_s30 = smov 0   ;;  %s1631_s10 = smov 0  }
   0xb   :  { %s1633_s11 = smov 0   ;;  %s1635_s12 = smov 0  }
   0xc LB: > { %2033 = sst [smem:[#allocation15_spill]] %s1548_s30  ;;  %s1650_s13 = sadd.s32 1, %s1560_s12   ;;  %s1560_s12 = sphi %s1635_s12, %s2062_s12   ;;  %s1556_s11 = sphi %s1633_s11, %s2064_s11   ;;  %s1552_s10 = sphi %s1631_s10, %s2066_s10   ;;  %s1548_s30 = sphi %s1629_s30, %s2065_s30  }
   0xd   : > { %2034 = sst [smem:[#allocation16_spill]] %s1556_s11  ;;  %s36_s14 = sadd.s32 1, %s1556_s11 }
   0xe   : > { %2035 = sst [smem:[#allocation17_spill]] %s1650_s13  ;;  %s33_s15 = ssub.s32 %s1560_s12, %s1650_s13 }
   0xf   : > { %p2013_p0 = scmp.ne.s32.totalorder %s1556_s11, %s1552_s10  ;;  %p34_p1 = scmp.eq.s32.totalorder %s33_s15, 0 }
  0x10   : > { %p44_p2 = scmp.eq.s32.totalorder %s1560_s12, 0  ;;  %p1297_p4 = scmp.lt.s32.totalorder %s1560_s12, 2 }
  0x11   : > { %s1661_s16 = scalar_select %p34_p1, %s1556_s11, %s36_s14  }
  0x12   : > { %p45_p5 = por %p44_p2, %p2013_p0  ;;  %s1667_s17 = sand.u32 1, %s1556_s11  }
  0x13   : > { %2036 = sst [smem:[#allocation18_spill]] %s1661_s16  ;;  %s339_s18 = sand.u32 1, %s1560_s12  }
  0x14   : > { %s1154_s19 = sshll.u32 %s1667_s17, 2  ;;  %p1671_p6 = pnand %p1297_p4, %p45_p5 }
  0x15   : > { %s1194_s21 = sshll.u32 %s1560_s12, 6  ;;  %s2038_s2 = sld [smem:[#allocation21_spill]] }
  0x16   : > { %s2037_s20 = scalar_select %p1671_p6, 1, 0 }
  0x17   : > { %s343_s25 = scalar_lea.vmem [#allocation5], %s1154_s19  ;;  %s1683_s27 = scalar_lea.sflag [#allocation6], %s339_s18 }
  0x18   : > { %s350_s26 = sshll.u32 %s343_s25, 4  ;;  %p1689_p8 = pneg %p1671_p6  ;;  %s1681_s26 = int_to_ptr.vmem [resolvable:$true] %s350_s26 }
  0x1a   : > { %s2039_s29 = scalar_select %p1689_p8, 1, 0 }
  0x1b   : > { %s1679_s24 = scalar_lea.hbm %s2038_s2, %s1194_s21  ;;  %s1373_s19 = scalar_lea.hbm %s2038_s2, 128 }
  0x1c   : > { %s1368_s28 = scalar_lea.hbm %s1679_s24, 64  ;;  %p1374_p11 = scmp.lt.u32.totalorder %s1679_s24, %s2038_s2 }
  0x1d   : > { %p1369_p7 = scmp.ne.s32.totalorder %s1679_s24, %s1368_s28  ;;  %p1375_p12 = scmp.lt.u32.totalorder %s1373_s19, %s1368_s28 }
  0x1e   : > { %p1377_p1 = scmp.lt.u32.totalorder %s1368_s28, %s1679_s24 }
  0x1f   : > { %p1371_p9 = pnand %p1689_p8, %p1369_p7  ;;  %p1376_p13 = por %p1375_p12, %p1374_p11 }
  0x21   : > { %p1372_p10 = pneg %p1371_p9  ;;  %p1378_p2 = por %p1377_p1, %p1376_p13 }
  0x23   : > { %p1379_p4 = pnand %p1378_p2, %p1372_p10 }
  0x25   : > { %1382 = shalt.err (!%p1379_p4)
}
  0x26   : > { %s1383_s18 = scalar_lea.vmem %s1681_s26, 64  ;;  %s1562_s23 = smov [#allocation5]  }
  0x27   : > { %p1384_p5 = scmp.ne.s32.totalorder %s1681_s26, %s1383_s18  ;;  %s1388_s25 = sshll.u32 %s1562_s23, 4  ;;  %s1389_s25 = int_to_ptr.vmem [resolvable:$false] %s1388_s25 }
  0x28   : > { %s1390_s14 = scalar_lea.vmem %s1389_s25, 128  ;;  %p1391_p3 = scmp.lt.s32.totalorder %s1681_s26, %s1389_s25 }
  0x29   : > { %p1386_p7 = pnand %p1384_p5, %p1689_p8  ;;  %p1392_p0 = scmp.lt.s32.totalorder %s1390_s14, %s1383_s18 }
  0x2b   : > { %p1387_p9 = pneg %p1386_p7  ;;  %p1393_p11 = por %p1392_p0, %p1391_p3 }
  0x2d   : > { %p1394_p12 = pnand %p1393_p11, %p1387_p9 }
  0x2f   : > { %1397 = shalt.err (!%p1394_p12)
}
  0x30   : > { %s1563_s28 = smov 32   ;;  %s1564_s15 = smov 2  }
  0x31   : > { %1288 = dma.hbm_to_vmem [thread:$0]  (!%p1671_p6), %s1679_s24, 64, %s1681_s26, %s1683_s27, %s1563_s28, %s1563_s28, %s1564_s15  }
  0x32   : > { %s1714_s19 = sadd.s32 4294967295, %s1560_s12   ;;  %s1147_s21 = sadd.s32 4294967294, %s1560_s12  }
  0x33   : > { %p49_p0 = scmp.ne.s32.totalorder %s1552_s10, %s1548_s30  ;;  %p2022_p3 = scmp.eq.s32.totalorder %s1714_s19, 0 }
  0x34   : > { %p261_p10 = scmp.eq.s32.totalorder %s1714_s19, 1  ;;  %p267_p13 = scmp.eq.s32.totalorder %s1147_s21, 1 }
  0x35   : > { %p1723_p1 = por %p2022_p3, %p49_p0  ;;  %p1148_p2 = scmp.ge.s32.totalorder %s1560_s12, 1 }
  0x36   : > { %p2041_p4 = scmp.ne.s32.totalorder %s1556_s11, %s1552_s10  ;;  %p1735_p7 = por %p267_p13, %p49_p0 }
  0x37   : > { %s2040_s22 = scalar_select %p1723_p1, 1, 0 }
  0x38   : > { %p1731_p5 = por %p261_p10, %p2041_p4  ;;  %p274_p9 = scmp.lt.s32.totalorder %s1560_s12, 3 }
  0x39   : > { %s2044_s26 = scalar_select %p1735_p7, 1, 0 }
  0x3a   : > { %s2042_s24 = scalar_select %p1731_p5, 1, 0 }
  0x3b   : > { %2045 = sst [smem:[#allocation20_spill]] %s2044_s26  ;;  %p1740_p11 = pnand %p1148_p2, %p274_p9 }
  0x3c   : > { %2043 = sst [smem:[#allocation19_spill]] %s2042_s24  ;;  %s1565_s23 = smov [#allocation8]  }
  0x3d   : > { %s2046_s18 = scalar_select %p1740_p11, 1, 0 }
  0x3e   : > { %s292_s25 = sshll.u32 %s1565_s23, 4  ;;  %p1278_p12 = pneg %p1740_p11  ;;  %s1744_s25 = int_to_ptr.vmem [resolvable:$true] %s292_s25 }
  0x3f   : > { %s1151_s14 = sshll.u32 %s1667_s17, 3  ;;  %s1193_s28 = sshll.u32 %s1560_s12, 7 }
  0x40   : > { %p1752_p10 = pnand %p1278_p12, %p2022_p3  ;;  %s1759_s16 = scalar_lea.hbm %s2003_s0, %s1193_s28 }
  0x41   : > { %s313_s11 = scalar_lea.vmem [#allocation2], %s1151_s14  ;;  %s1398_s30 = scalar_lea.hbm %s2010_s7, 256 }
  0x42   : > { %s320_s13 = sshll.u32 %s313_s11, 4  ;;  %p1399_p0 = scmp.ne.s32.totalorder %s2010_s7, %s1398_s30  ;;  %s1761_s13 = int_to_ptr.vmem [resolvable:$true] %s320_s13 }
  0x43   : > { %p1400_p13 = pneg %p1752_p10  ;;  %p1405_p9 = scmp.lt.u32.totalorder %s1398_s30, %s2010_s7 }
  0x45   : > { %p1401_p2 = pnand %p1400_p13, %p1399_p0 }
  0x47   : > { %p1402_p4 = pneg %p1401_p2 }
  0x49   : > { %p1407_p12 = pnand %p1405_p9, %p1402_p4 }
  0x4b   : > { %1410 = shalt.err (!%p1407_p12)
}
  0x4c   : > { %s1411_s11 = scalar_lea.vmem %s1744_s25, 256  ;;  %p1419_p1 = scmp.lt.s32.totalorder %s1744_s25, %s1744_s25 }
  0x4d   : > { %p1412_p3 = scmp.ne.s32.totalorder %s1744_s25, %s1411_s11  ;;  %p1420_p11 = scmp.lt.s32.totalorder %s1411_s11, %s1411_s11 }
  0x4f   : > { %p1414_p7 = pnand %p1412_p3, %p1400_p13  ;;  %p1421_p6 = por %p1420_p11, %p1419_p1 }
  0x51   : > { %p1415_p5 = pneg %p1414_p7 }
  0x53   : > { %p1422_p8 = pnand %p1421_p6, %p1415_p5 }
  0x55   : > { %1425 = shalt.err (!%p1422_p8)
}
  0x56   : > { %s1566_s9 = smov 64   ;;  %s1567_s30 = smov 4  }
  0x57   : > { %1281 = dma.hbm_to_vmem [thread:$0]  (!%p1752_p10), %s2010_s7, 256, %s1744_s25, [#allocation9], %s1566_s9, %s1566_s9, %s1567_s30  }
  0x58   : > { %s310_s14 = scalar_lea.sflag [#allocation3], %s1667_s17  ;;  %s1426_s28 = scalar_lea.hbm %s1759_s16, 128 }
  0x59   : > { %p1427_p6 = scmp.ne.s32.totalorder %s1759_s16, %s1426_s28  ;;  %p2048_p8 = scmp.ne.s32.totalorder %s2039_s29, 0 }
  0x5a   : > { %s1431_s21 = scalar_lea.hbm %s2003_s0, 256  ;;  %p1432_p5 = scmp.lt.u32.totalorder %s1759_s16, %s2003_s0 }
  0x5b   : > { %p1429_p3 = pnand %p1427_p6, %p2048_p8  ;;  %p1433_p7 = scmp.lt.u32.totalorder %s1431_s21, %s1426_s28 }
  0x5c   : > { %p1435_p0 = scmp.lt.u32.totalorder %s1426_s28, %s1759_s16 }
  0x5d   : > { %p1430_p1 = pneg %p1429_p3  ;;  %p1434_p11 = por %p1433_p7, %p1432_p5 }
  0x5f   : > { %p1436_p13 = por %p1435_p0, %p1434_p11 }
  0x61   : > { %p1437_p2 = pnand %p1436_p13, %p1430_p1 }
  0x63   : > { %1440 = shalt.err (!%p1437_p2)
}
  0x64   : > { %s1441_s25 = scalar_lea.vmem %s1761_s13, 128  ;;  %s1568_s15 = smov [#allocation2]  }
  0x65   : > { %p1442_p10 = scmp.ne.s32.totalorder %s1761_s13, %s1441_s25  ;;  %s1446_s24 = sshll.u32 %s1568_s15, 4  ;;  %s1447_s24 = int_to_ptr.vmem [resolvable:$false] %s1446_s24 }
  0x66   : > { %s1448_s8 = scalar_lea.vmem %s1447_s24, 256  ;;  %p1449_p12 = scmp.lt.s32.totalorder %s1761_s13, %s1447_s24 }
  0x67   : > { %p1444_p4 = pnand %p1442_p10, %p2048_p8  ;;  %p1450_p6 = scmp.lt.s32.totalorder %s1448_s8, %s1441_s25 }
  0x69   : > { %p1445_p9 = pneg %p1444_p4  ;;  %p1451_p3 = por %p1450_p6, %p1449_p12 }
  0x6b   : > { %p1452_p5 = pnand %p1451_p3, %p1445_p9 }
  0x6d   : > { %1455 = shalt.err (!%p1452_p5)
}
  0x6e   : > { %p2049_p1 = scmp.ne.s32.totalorder %s2037_s20, 0  ;;  %s1157_s26 = sshll.u32 %s1667_s17, 1 }
  0x6f   : > { %s1195_s28 = sshll.u32 %s1560_s12, 5  ;;  %s364_s11 = scalar_lea.vmem [#allocation7], %s1157_s26 }
  0x70   : > { %1285 = dma.hbm_to_vmem [thread:$0]  (!%p2049_p1), %s1759_s16, 128, %s1761_s13, %s310_s14, %s1566_s9, %s1566_s9, %s1567_s30  }
  0x71   : > { %s1819_s21 = scalar_lea.hbm %s2006_s3, %s1195_s28  ;;  %s371_s25 = sshll.u32 %s364_s11, 4  ;;  %s1821_s25 = int_to_ptr.vmem [resolvable:$true] %s371_s25 }
  0x72   : > { %s1456_s15 = scalar_lea.hbm %s1819_s21, 32  ;;  %s1461_s17 = scalar_lea.hbm %s2006_s3, 64 }
  0x73   : > { %p1457_p7 = scmp.ne.s32.totalorder %s1819_s21, %s1456_s15  ;;  %p1462_p13 = scmp.lt.u32.totalorder %s1819_s21, %s2006_s3 }
  0x74   : > { %p1463_p2 = scmp.lt.u32.totalorder %s1461_s17, %s1456_s15  ;;  %p1465_p4 = scmp.lt.u32.totalorder %s1456_s15, %s1819_s21 }
  0x75   : > { %p1459_p11 = pnand %p1457_p7, %p2048_p8 }
  0x76   : > { %p1464_p10 = por %p1463_p2, %p1462_p13 }
  0x77   : > { %p1460_p0 = pneg %p1459_p11 }
  0x78   : > { %p1466_p9 = por %p1465_p4, %p1464_p10 }
  0x7a   : > { %p1467_p12 = pnand %p1466_p9, %p1460_p0 }
  0x7c   : > { %1470 = shalt.err (!%p1467_p12)
}
  0x7d   : > { %s1471_s14 = scalar_lea.vmem %s1821_s25, 32  ;;  %s1569_s24 = smov [#allocation7]  }
  0x7e   : > { %p1472_p6 = scmp.ne.s32.totalorder %s1821_s25, %s1471_s14  ;;  %s1476_s8 = sshll.u32 %s1569_s24, 4  ;;  %s1477_s8 = int_to_ptr.vmem [resolvable:$false] %s1476_s8 }
  0x7f   : > { %s1478_s26 = scalar_lea.vmem %s1477_s8, 64  ;;  %p1479_p7 = scmp.lt.s32.totalorder %s1821_s25, %s1477_s8 }
  0x80   : > { %p1474_p3 = pnand %p1472_p6, %p2048_p8  ;;  %p1480_p11 = scmp.lt.s32.totalorder %s1478_s26, %s1471_s14 }
  0x82   : > { %p1475_p5 = pneg %p1474_p3  ;;  %p1481_p13 = por %p1480_p11, %p1479_p7 }
  0x84   : > { %p1482_p2 = pnand %p1481_p13, %p1475_p5 }
  0x86   : > { %1485 = shalt.err (!%p1482_p2)
}
  0x87   : > { %s1570_s28 = smov 16   ;;  %s1571_s23 = smov 1  }
  0x88   : > { %1291 = dma.hbm_to_vmem [thread:$0]  (!%p2049_p1), %s1819_s21, 32, %s1821_s25, %s1683_s27, %s1570_s28, %s1570_s28, %s1571_s23  }
  0x89   : > { %p2050_p8 = scmp.ne.s32.totalorder %s2046_s18, 0 }
  0x8a   : > { %s1848_s29 = sand.u32 (!%p2050_p8), 1, %s1552_s10   ;;  %p2051_p0 = scmp.ne.s32.totalorder (!%p2050_p8), %s2040_s22, 0 }
  0x8b   : > { %392 = sbr.rel (%p2050_p8) target bundleno = 1485 (0x5cd), region = 56  ;;  %s1161_s2 = sshll.u32 (!%p2050_p8), %s1848_s29, 3 }
  0x8c   : > { %s395_s11 = scalar_lea.sflag (!%p2050_p8), [#allocation3], %s1848_s29  ;;  %s398_s15 = scalar_lea.vmem (!%p2050_p8), [#allocation2], %s1161_s2 }
  0x92   : > { %1531 = dma.done.wait (%p2051_p0), %s395_s11, 128  }
  0x93   : > { %1533 = vsyncadd (%p2051_p0), %s395_s11, 4294967168  ;;  %s403_s20 = sand.u32 1, %s1714_s19   ;;  %s1162_s27 = sshll.u32 %s1848_s29, 2 }
  0x94   : > { %s404_s18 = scalar_lea.sflag [#allocation6], %s403_s20  ;;  %s1858_s21 = scalar_lea.vmem [#allocation5], %s1162_s27 }
  0x95   : > { %1535 = dma.done.wait (%p2051_p0), %s404_s18, 96  }
  0x96   : > { %1537 = vsyncadd (%p2051_p0), %s404_s18, 4294967200  ;;  %s1163_s25 = sshll.u32 %s1848_s29, 1  ;;  %p2052_p1 = scmp.eq.s32.totalorder %s1714_s19, 0 }
  0x97   : > { %s1865_s13 = scalar_lea.vmem [#allocation7], %s1163_s25 }
  0x98   : > { %1539 = dma.done.wait (%p2052_p1), [#allocation9], 256   ;;  %p2053_p10 = pmov %p2052_p1 }
  0x99   : > { %v1572_v0 = vmov 0.0   ;;  %vm1573_vm0 = vmmov 0   ;;  %v1347_v1 = vld [vmem:[%s2008_s5] sm:$0xff]   ;;  %s1574_s17 = smov 96   ;;  %v1348_v2 = vld [vmem:[%s2008_s5 + $0x8] sm:$0xff]   ;;  %vm525_vm1 = vcmask 261120  }
  0x9a   : > { %1541 = vsyncadd (%p2053_p10), [#allocation9], 4294967040  ;;  %1226 = vmatprep.subr.bf16.mxu1 %v1572_v0  ;;  %1218 = vmatprep.subr.bf16.mxu0 %v1572_v0  ;;  %v1349_v3 = vld [vmem:[%s398_s15] sm:$0xff]   ;;  %s1166_s8 = sshll.u32 %s1714_s19, 1  ;;  %v1198_v31 = vld [vmem:[%s1858_s21] sm:$0xf]  }
  0x9b   : > { %1230 = vmatprep.mubr.msk.bf16.mxu1 %vm1573_vm0, %v1572_v0  ;;  %1222 = vmatprep.mubr.msk.bf16.mxu0 %vm1573_vm0, %v1572_v0  ;;  %v1170_v4 = vld [vmem:[%s2009_s6] ss:$0 sm:$0xff]  ;;  %p477_p4 = scmp.lt.s32.totalorder %s1166_s8, 3  ;;  %v1199_v32 = vunpack.c.0.s8 %v1198_v31  ;;  %v1200_v33 = vunpack.c.1.s8 %v1198_v31  ;;  %v1178_v41 = vld [vmem:[%s1865_s13] ss:$0 sm:$0xff]  ;;  %vm747_vm2 = vcmask 64512  }
  0x9c   : > { %572 = vrot.lane.b32.xlu0 %v1347_v1, %s1574_s17  ;;  %1219 = vmatpush3.bf16.msra.mxu0 %v1347_v1  ;;  %v1179_v46 = vld [vmem:[%s1865_s13 + $0x1] ss:$0 sm:$0xff]  ;;  %vm778_vm3 = vcmask 1043456   ;;  %s1165_s27 = sshll.u32 %s1848_s29, 4  ;;  %s2054_s25 = sld [smem:[#allocation22_spill]] }
  0x9d   : > { %1220 = vmatprep.subr.bf16.mxu0 %v1572_v0  ;;  %578 = vrot.lane.b32.xlu1 %v1170_v4, %s1574_s17  ;;  %s2068_s8 = smov (!%p477_p4, %s1166_s8), 3  ;;  %v633_v34 = vcvt.s32.f32 %v1199_v32  ;;  %v634_v35 = vcvt.s32.f32 %v1200_v33  ;;  %s2055_s13 = sld [smem:[#allocation19_spill]] }
  0x9e   : > { %s1167_s26 = sshll.u32 %s2068_s8, 3  ;;  %s1196_s22 = sshll.u32 %s1714_s19, 8 }
  0x9f   : > { %s480_s2 = scalar_lea.vmem %s2004_s1, %s1167_s26  ;;  %v635_v36 = vsub.f32 1.0, %v633_v34  ;;  %v636_v37 = vsub.f32 1.0, %v634_v35  ;;  %s488_s20 = scalar_lea.vmem %s2007_s4, %s1167_s26 }
  0xa0   : > { %574 = vrot.lane.b32.xlu0 %v1348_v2, %s1574_s17  ;;  %1221 = vmatpush3.bf16.msra.mxu0 %v1348_v2  ;;  %v1903_v6 = vld [vmem:[%s480_s2] sm:$0xff]  ;;  %v1905_v7 = vld [vmem:[%s480_s2 + $0x8] sm:$0xff]  ;;  %s474_s16 = scalar_lea.vmem [#allocation10], %s1165_s27  ;;  %s2056_s14 = sld [smem:[#allocation23_spill]] }
  0xa1   : > { %1234 = vmatprep.subr.bf16.mxu0 %v1572_v0  ;;  %v496_v9 = vpack.c.bf16 %v1905_v7, %v1903_v6  ;;  %v637_v38 = vmul.f32 -100.0, %v635_v36  ;;  %v638_v39 = vmul.f32 -100.0, %v636_v37  ;;  %s984_s19 = scalar_lea.sflag [#allocation4], %s1848_s29  ;;  %s1576_s26 = smov [#allocation10]  }
  0xa2   : > { %s1490_s28 = sshll.u32 %s1576_s26, 4  ;;  %s1491_s28 = int_to_ptr.vmem [resolvable:$false] %s1490_s28 }
  0xa3   : > { %1223 = vmatmul.mubr.msk.bf16.vlgmr.msra.gmra.mrb[0].mxu0 %vm525_vm1, %v1349_v3  ;;  %p2057_p12 = scmp.ne.s32.totalorder %s2055_s13, 0  ;;  %s1492_s23 = scalar_lea.vmem %s1491_s28, 512 }
  0xa4   : > { %1236 = vmatprep.mubr.msk.bf16.mxu0 %vm1573_vm0, %v1572_v0 }
  0xa6   : > { %s1955_s24 = scalar_lea.hbm %s2056_s14, %s1196_s22 }
 0x10e   : > { %v573_v5 = vpop.permute.xlu0 %572 }
 0x10f   : > { %1227 = vmatpush3.bf16.msra.mxu1 %v573_v5  ;;  %v579_v14 = vpop.permute.xlu1 %578 }
 0x110   : > { %1228 = vmatprep.subr.bf16.mxu1 %v1572_v0 }
 0x112   : > { %v575_v8 = vpop.permute.xlu0 %574 }
 0x113   : > { %1229 = vmatpush3.bf16.msra.mxu1 %v575_v8 }
 0x114   : > { %1240 = vmatprep.subr.bf16.mxu1 %v1572_v0 }
 0x116   : > { %1231 = vmatmul.mubr.msk.bf16.vlgmr.msra.gmra.mrb[0].mxu1 %vm525_vm1, %v496_v9 }
 0x117   : > { %1242 = vmatprep.mubr.msk.bf16.mxu1 %vm1573_vm0, %v1572_v0 }
 0x176   : > { %v563_v10 = vpop.f32.mrb[0].mxu0 }
 0x177   : > { %v1224_v11 = vpop.f32.mrb[1].mxu0  ;;  %v564_v18 = vadd.f32 %v1170_v4, %v563_v10 }
 0x178   : > { %v566_v12 = vpop.f32.mrb[2].mxu0 }
 0x179   : > { %v1225_v13 = vpop.f32.mrb[3].mxu0  ;;  %v570_v25 = vmul.f32 0.17677669, %v564_v18  ;;  %v567_v26 = vadd.f32 %v1170_v4, %v566_v12  ;;  %v939_v18 = vld [vmem:[%s488_s20] sm:$0xff] }
 0x17b   : > { %v625_v28 = vpack.c.bf16 %v570_v25, %v570_v25  ;;  %v571_v29 = vmul.f32 0.17677669, %v567_v26 }
 0x17d   : > { %v626_v30 = vpack.c.bf16 %v571_v29, %v571_v29 }
 0x1e9   : > { %v618_v15 = vpop.f32.mrb[0].mxu1 }
 0x1ea   : > { %v619_v16 = vadd.f32 %v618_v15, %v579_v14  ;;  %v1232_v17 = vpop.f32.mrb[1].mxu1 }
 0x1eb   : > { %v621_v19 = vpop.f32.mrb[2].mxu1 }
 0x1ec   : > { %v627_v20 = vpack.c.bf16 %v619_v16, %v619_v16  ;;  %v622_v21 = vadd.f32 %v621_v19, %v579_v14  ;;  %v1233_v22 = vpop.f32.mrb[3].mxu1  ;;  %v1350_v14 = vld [vmem:[#allocation8] sm:$0xff]   ;;  %v1186_v19 = vmul.f32 -1.442695, %v939_v18 }
 0x1ee   : > { %v643_v23 = vsel %vm525_vm1, %v627_v20, 0  ;;  %v628_v24 = vpack.c.bf16 %v622_v21, %v622_v21 }
 0x1ef   : > { %1235 = vmatpush3.bf16.xpose.msra.mxu0 %v643_v23 }
 0x1f0   : > { %v689_v27 = vsel %vm525_vm1, %v628_v24, 0  ;;  %1246 = vmatprep.subr.bf16.mxu0 %v1572_v0 }
 0x1f1   : > { %1241 = vmatpush3.bf16.xpose.msra.mxu1 %v689_v27 }
 0x1f2   : > { %1252 = vmatprep.subr.bf16.mxu1 %v1572_v0 }
 0x1f6   : > { %1237 = vmatmul.mubr.msk.bf16.vlgmr.msra.gmra.mrb[4].mxu0 %vm525_vm1, %v625_v28 }
 0x1f7   : > { %1248 = vmatprep.mubr.msk.bf16.mxu0 %vm1573_vm0, %v1572_v0 }
 0x1f8   : > { %1243 = vmatmul.mubr.msk.bf16.vlgmr.msra.gmra.mrb[4].mxu1 %vm525_vm1, %v626_v30 }
 0x1f9   : > { %1254 = vmatprep.mubr.msk.bf16.mxu1 %vm1573_vm0, %v1572_v0 }
 0x2c9   : > { %v679_v40 = vpop.f32.mrb[4].mxu0 }
 0x2ca   : > { %v680_v42 = vadd.f32 %v679_v40, %v637_v38  ;;  %v1238_v43 = vpop.f32.mrb[5].mxu0 }
 0x2cb   : > { %v682_v44 = vpop.f32.mrb[6].mxu0  ;;  %v725_v45 = vpop.f32.mrb[4].mxu1 }
 0x2cc   : > { %v726_v47 = vadd.f32 %v725_v45, %v638_v39  ;;  %v1239_v48 = vpop.f32.mrb[7].mxu0  ;;  %v1244_v49 = vpop.f32.mrb[5].mxu1  ;;  %v745_v50 = vadd.f32 %v1178_v41, %v680_v42  ;;  %v1182_v41 = vld [vmem:[%s2054_s25] ss:$0 sm:$0xff] }
 0x2cd   : > { %v728_v51 = vpop.f32.mrb[6].mxu1 }
 0x2ce   : > { %v1245_v52 = vpop.f32.mrb[7].mxu1  ;;  %v748_v53 = vsel %vm747_vm2, %v745_v50, -inf  ;;  %v746_v54 = vadd.f32 %v1179_v46, %v726_v47 }
 0x2cf   : > { %749 = vmax.xlane.f32.xlu1 %v748_v53 }
 0x2d0   : > { %v751_v55 = vsel %vm747_vm2, %v746_v54, -inf }
 0x2d1   : > { %752 = vmax.xlane.f32.xlu0 %v751_v55 }
 0x35c   : > { %v750_v56 = vpop.xlane.xlu1 %749 }
 0x35d   : > { %v754_v57 = vsub.f32 %v745_v50, %v750_v56 }
 0x35e   : > { %v753_v58 = vpop.xlane.xlu0 %752 }
 0x35f   : > { %v756_v59 = vmul.f32 1.442695, %v754_v57  ;;  %v755_v60 = vsub.f32 %v746_v54, %v753_v58 }
 0x361   : > { %1352 = vpow2.f32 %v756_v59  ;;  %v758_v61 = vmul.f32 1.442695, %v755_v60 }
 0x363   : > { %1354 = vpow2.f32 %v758_v61 }
 0x36b   : > { %v1353_v62 = vpop.eup %1352 }
 0x36c   : > { %v760_v63 = vsel %vm747_vm2, %v1353_v62, 0.0 }
 0x36d   : > { %v1355_v1 = vpop.eup %1354  ;;  %761 = vadd.xlane.f32.xlu0 %v760_v63 }
 0x36e   : > { %v763_v2 = vsel %vm747_vm2, %v1355_v1, 0.0 }
 0x36f   : > { %764 = vadd.xlane.f32.xlu1 %v763_v2 }
 0x380   : > { %823 = vrot.lane.b32.xlu1 %v628_v24, %s1574_s17  ;;  %v1351_v24 = vld [vmem:[#allocation8 + $0x8] sm:$0xff]  }
 0x383   : > { %773 = vrot.lane.b32.xlu0 %v627_v20, %s1574_s17  ;;  %v940_v20 = vld [vmem:[%s488_s20 + $0x8] sm:$0xff]  ;;  %s997_s17 = sshll.u32 %s474_s16, 4  ;;  %s1957_s17 = int_to_ptr.vmem [resolvable:$true] %s997_s17 }
 0x384   : > { %v1187_v22 = vmul.f32 -1.442695, %v940_v20  ;;  %s1486_s8 = scalar_lea.vmem %s1957_s17, 256  ;;  %p1493_p5 = scmp.lt.s32.totalorder %s1957_s17, %s1491_s28 }
 0x385   : > { %p1487_p9 = scmp.ne.s32.totalorder %s1957_s17, %s1486_s8  ;;  %p1494_p7 = scmp.lt.s32.totalorder %s1492_s23, %s1486_s8 }
 0x387   : > { %p1488_p6 = pnand %p1487_p9, %p2057_p12  ;;  %p1495_p11 = por %p1494_p7, %p1493_p5 }
 0x389   : > { %p1489_p3 = pneg %p1488_p6 }
 0x38b   : > { %p1496_p13 = pnand %p1495_p11, %p1489_p3 }
 0x3fa   : > { %v762_v3 = vpop.xlane.xlu0 %761 }
 0x3fb   : > { %1356 = vrcp.f32 %v762_v3 }
 0x3fc   : > { %v765_v4 = vpop.xlane.xlu1 %764 }
 0x3fd   : > { %1358 = vrcp.f32 %v765_v4 }
 0x3fe   : > { %v774_v5 = vpop.permute.xlu0 %773  ;;  %1360 = vpow2.f32 %v1186_v19 }
 0x3ff   : > { %v780_v8 = vsel %vm778_vm3, %v774_v5, 0  ;;  %1362 = vpow2.f32 %v1187_v22 }
 0x400   : > { %v824_v9 = vpop.permute.xlu1 %823  ;;  %1247 = vmatpush3.bf16.msra.mxu0 %v780_v8 }
 0x401   : > { %v829_v10 = vsel %vm778_vm3, %v824_v9, 0  ;;  %1258 = vmatprep.subr.bf16.mxu0 %v1572_v0 }
 0x402   : > { %1253 = vmatpush3.bf16.msra.mxu1 %v829_v10 }
 0x405   : > { %v1357_v11 = vpop.eup %1356 }
 0x406   : > { %v768_v12 = vmul.f32 %v1357_v11, %v1353_v62 }
 0x407   : > { %v1359_v13 = vpop.eup %1358 }
 0x408   : > { %v769_v15 = vmul.f32 %v1359_v13, %v1355_v1  ;;  %v770_v16 = vpack.c.bf16 %v768_v12, %v768_v12  ;;  %v1361_v21 = vpop.eup %1360 }
 0x409   : > { %v947_v23 = vadd.f32 1.0, %v1361_v21  ;;  %v1363_v25 = vpop.eup %1362 }
 0x40a   : > { %1249 = vmatmul.mubr.msk.bf16.vlgmr.msra.gmra.mrb[8].mxu0 %vm747_vm2, %v770_v16  ;;  %v771_v17 = vpack.c.bf16 %v769_v15, %v769_v15  ;;  %v948_v27 = vadd.f32 1.0, %v1363_v25 }
 0x40b   : > { %1259 = vmatpush3.bf16.msra.mxu0 %v1350_v14  ;;  %1262 = vmatprep.mubr.msk.bf16.mxu0 %vm1573_vm0, %v1572_v0  ;;  %1364 = vrcp.f32 %v947_v23 }
 0x40c   : > { %1255 = vmatmul.mubr.msk.bf16.vlgmr.msra.gmra.mrb[8].mxu1 %vm747_vm2, %v771_v17  ;;  %1260 = vmatprep.subr.bf16.mxu0 %v1572_v0  ;;  %v1575_v0 = vmov 0   ;;  %1366 = vrcp.f32 %v948_v27 }
 0x40d   : > { %1345 = vset.pattern.permute.xlu1 %v1575_v0  ;;  %1346 = vset.pattern.permute.xlu0 %v1575_v0 }
 0x40f   : > { %1261 = vmatpush3.bf16.msra.mxu0 %v1351_v24 }
 0x415   : > { %v1365_v26 = vpop.eup %1364 }
 0x416   : > { %955 = vperm.xlu1 %1345, %v1365_v26   ;;  %v967_v28 = vsub.f32 1.0, %v1365_v26  ;;  %v1367_v29 = vpop.eup %1366 }
 0x417   : > { %v968_v30 = vsub.f32 1.0, %v1367_v29  ;;  %960 = vperm.xlu0 %1346, %v1367_v29  }
 0x41a   : > { %971 = vperm.xlu1 %1345, %v967_v28  }
 0x41e   : > { %976 = vperm.xlu1 %1345, %v968_v30  }
 0x495   : > { %v956_v40 = vpop.permute.xlu1 %955 }
 0x496   : > { %v961_v42 = vpop.permute.xlu0 %960  ;;  %v963_v45 = vmul.f32 %v956_v40, %v1903_v6 }
 0x497   : > { %v964_v48 = vmul.f32 %v961_v42, %v1905_v7 }
 0x499   : > { %v972_v43 = vpop.permute.xlu1 %971 }
 0x49d   : > { %v977_v55 = vpop.permute.xlu1 %976 }
 0x4dd   : > { %v816_v31 = vpop.f32.mrb[8].mxu0 }
 0x4de   : > { %v1250_v32 = vpop.f32.mrb[9].mxu0 }
 0x4df   : > { %v819_v33 = vpop.f32.mrb[10].mxu0  ;;  %v865_v34 = vpop.f32.mrb[8].mxu1 }
 0x4e0   : > { %v871_v35 = vpack.c.bf16 %v865_v34, %v816_v31  ;;  %v1251_v36 = vpop.f32.mrb[11].mxu0  ;;  %v1256_v37 = vpop.f32.mrb[9].mxu1 }
 0x4e1   : > { %v868_v38 = vpop.f32.mrb[10].mxu1 }
 0x4e2   : > { %v1257_v39 = vpop.f32.mrb[11].mxu1  ;;  %1263 = vmatmul.mubr.msk.bf16.vlgmr.msra.gmra.mrb[12].mxu0 %vm525_vm1, %v871_v35 }
 0x5b5   : > { %v932_v44 = vpop.f32.mrb[12].mxu0 }
 0x5b6   : > { %v933_v46 = vadd.f32 %v1182_v41, %v932_v44  ;;  %v1264_v47 = vpop.f32.mrb[13].mxu0 }
 0x5b7   : > { %v935_v49 = vpop.f32.mrb[14].mxu0 }
 0x5b8   : > { %v965_v50 = vadd.f32 %v963_v45, %v933_v46  ;;  %v936_v51 = vadd.f32 %v1182_v41, %v935_v49  ;;  %v1265_v52 = vpop.f32.mrb[15].mxu0 }
 0x5ba   : > { %v979_v53 = vadd.f32 %v972_v43, %v965_v50  ;;  %v966_v54 = vadd.f32 %v964_v48, %v936_v51 }
 0x5bc   : > { %981 = vst.msk [vmem:[%s474_s16] sm:$0xff] %vm525_vm1, %v979_v53  ;;  %v980_v6 = vadd.f32 %v977_v55, %v966_v54 }
 0x5be   : > { %982 = vst.msk [vmem:[%s474_s16 + $0x8] sm:$0xff] %vm525_vm1, %v980_v6 }
 0x5bf   : > { %1499 = shalt.err (!%p1496_p13)
}
 0x5c0   : > { %s1500_s2 = scalar_lea.hbm %s1955_s24, 256  ;;  %s1504_s20 = scalar_lea.hbm %s2056_s14, 512 }
 0x5c1   : > { %p1501_p2 = scmp.ne.s32.totalorder %s1955_s24, %s1500_s2  ;;  %p1505_p1 = scmp.lt.u32.totalorder %s1955_s24, %s2056_s14 }
 0x5c2   : > { %p1506_p10 = scmp.lt.u32.totalorder %s1504_s20, %s1500_s2  ;;  %p1508_p9 = scmp.lt.u32.totalorder %s1500_s2, %s1955_s24 }
 0x5c3   : > { %p1502_p8 = pnand %p1501_p2, %p2057_p12 }
 0x5c4   : > { %p1507_p4 = por %p1506_p10, %p1505_p1 }
 0x5c5   : > { %p1503_p0 = pneg %p1502_p8 }
 0x5c6   : > { %p1509_p6 = por %p1508_p9, %p1507_p4 }
 0x5c8   : > { %p1510_p3 = pnand %p1509_p6, %p1503_p0 }
 0x5ca   : > { %1513 = shalt.err (!%p1510_p3)
}
 0x5cb   : > { %s1577_s21 = smov 128   ;;  %s1578_s25 = smov 8  }
 0x5cc   : > { %1276 = dma.vmem_to_hbm [thread:$0]  (%p2057_p12), %s1957_s17, 256, %s1955_s24, %s984_s19, %s1577_s21, %s1577_s21, %s1578_s25  }
 0x5cd PF: > { %s2058_s22 = sld [smem:[#allocation15_spill]]  ;;  %s2059_s16 = sld [smem:[#allocation20_spill]] }
 0x5ce   : > { %p2061_p7 = scmp.ge.s32.totalorder %s1560_s12, 2 }
 0x5d3   : > { %s1012_s9 = sand.u32 1, %s2058_s22   ;;  %p2060_p5 = scmp.ne.s32.totalorder %s2059_s16, 0 }
 0x5d4   : > { %s1013_s30 = scalar_lea.sflag [#allocation4], %s1012_s9 }
 0x5d5   : > { %p1293_p11 = pnand %p2061_p7, %p2060_p5 }
 0x5d7   : > { %1543 = dma.done.wait (!%p1293_p11), %s1013_s30, 256  }
 0x5d8   : > { %1545 = vsyncadd (!%p1293_p11), %s1013_s30, 4294967040  ;;  %s2062_s12 = sld [smem:[#allocation17_spill]]  ;;  %s2063_s8 = sld [smem:[#allocation16_spill]] }
 0x5d9   : > { %s2064_s11 = sld [smem:[#allocation18_spill]]  ;;  %s2065_s30 = smov %s1552_s10 }
 0x5de   : > { %p26_p13 = scmp.ge.s32.totalorder %s2062_s12, 4   ;;  %s2066_s10 = smov %s2063_s8 }
 0x5e0   :  { %28 = sbr.rel (!%p26_p13) target bundleno = 12 (0xc), region = 135 }
 0x5e7   :  { %1018 = vsyncpa [#allocation3], 1 }
 0x5e8   :  { %1020 = vsyncpa [#allocation3 + $0x1], 1 }
 0x5e9   :  { %1021 = vsyncpa [#allocation6], 1 }
 0x5ea   :  { %1023 = vsyncpa [#allocation6 + $0x1], 1 }
 0x5eb   :  { %1024 = vsyncpa [#allocation9], 1 }
 0x5ec   :  { %1025 = vsyncpa [#allocation4], 1 }
 0x5ed   :  { %1027 = vsyncpa [#allocation4 + $0x1], 1 }

</bundles_post_ra>
